<compile_context>
chip_gen: v5e
topology: v5e:2x2
jax: 0.10.0
libtpu: 0.0.40
codegen_flags: <defaults>
</compile_context>

<pallas_src>
import functools

import jax
import jax.numpy as jnp
from jax.experimental import pallas as pl
from jax.experimental.pallas import tpu as pltpu

_LANE = 128
_SUBLANE = 8


def _round_up(x, m):
    return ((x + m - 1) // m) * m


@functools.lru_cache(maxsize=1)
def _tensorcores_per_chip():
    """2 on megacore parts (v7x), else 1. Conservative fallback = 1."""
    try:
        kind = (jax.devices()[0].device_kind or "").lower()
        if "v7" in kind or "7x" in kind:
            return 2
    except Exception:
        pass
    return 1


# --------------------------------------------------------------------------- #
# Kernel
# --------------------------------------------------------------------------- #
def _decoder_kernel(x_ref, w1_ref, b1_ref, w2_ref, b2_ref, wh_ref, bh_ref, out_ref):
    """One batch-tile of the TrajectoryDecoder forward pass.

    x           : [TB, K]        concatenated (state|action|latent), bf16
    w1, b1      : [K, H_pad] bf16, [1, H_pad] f32
    w2, b2      : [H_pad, H_pad] bf16, [1, H_pad] f32
    wh, bh      : fused (state|reward) head, [H_pad, P] bf16, [1, P] f32
    out_ref     : [TB, P]        lane-dense fused output (f32)
    """
    # shared layer 1 (single matmul over the pre-concatenated input)
    h = jnp.dot(x_ref[...], w1_ref[...], preferred_element_type=jnp.float32)
    h = jnp.maximum(h + b1_ref[...], 0.0)

    # shared layer 2
    h = jnp.dot(h.astype(w2_ref.dtype), w2_ref[...],
                preferred_element_type=jnp.float32)
    h = jnp.maximum(h + b2_ref[...], 0.0)

    # fused heads (states | reward | zero-pad)
    out = jnp.dot(h.astype(wh_ref.dtype), wh_ref[...],
                  preferred_element_type=jnp.float32) + bh_ref[...]
    out_ref[...] = out.astype(out_ref.dtype)


# --------------------------------------------------------------------------- #
# Wrappers
# --------------------------------------------------------------------------- #
def prepare_decoder_params(params, *, compute_dtype=jnp.bfloat16):
    """Pad / fuse the raw (PyTorch-layout) parameters ONCE, at load time.

    Zero-padding keeps the math exact; heads are fused into one lane-dense
    [H_pad, P] matrix.  Do NOT call this inside the per-step forward.
    """
    w1 = params["w1"]
    H = w1.shape[1]
    S = params["ws"].shape[1]
    H_pad = _round_up(H, _LANE)
    P = _round_up(S + 1, _LANE)

    wh = jnp.concatenate([params["ws"], params["wr"]], axis=1)
    bh = jnp.concatenate([params["bs"], params["br"]], axis=1)

    return {
        "w1": jnp.pad(w1, ((0, 0), (0, H_pad - H))).astype(compute_dtype),
        "b1": jnp.pad(params["b1"], ((0, 0), (0, H_pad - H))).astype(jnp.float32),
        "w2": jnp.pad(params["w2"],
                      ((0, H_pad - H), (0, H_pad - H))).astype(compute_dtype),
        "b2": jnp.pad(params["b2"], ((0, 0), (0, H_pad - H))).astype(jnp.float32),
        "wh": jnp.pad(wh, ((0, H_pad - H), (0, P - (S + 1)))).astype(compute_dtype),
        "bh": jnp.pad(bh, ((0, 0), (0, P - (S + 1)))).astype(jnp.float32),
    }


@functools.partial(jax.jit, static_argnames=("batch_tile", "out_dtype"))
def trajectory_decoder_forward_fused(current_states, current_actions,
                                     task_embeddings, prepared, *,
                                     batch_tile=1024, out_dtype=jnp.float32):
    """Fused forward: returns the padded [B_pad, P] (state|reward|0) slab.

    Consumers that can read the fused layout directly avoid the post-kernel
    slice copies entirely.
    """
    B = current_states.shape[0]
    w1, b1 = prepared["w1"], prepared["b1"]
    w2, b2 = prepared["w2"], prepared["b2"]
    wh, bh = prepared["wh"], prepared["bh"]
    K, H_pad = w1.shape
    P = wh.shape[1]
    cdt = w1.dtype

    # ---- single concatenated input (one DMA stream, one layer-1 matmul) ----
    x = jnp.concatenate([current_states, current_actions, task_embeddings],
                        axis=-1).astype(cdt)

    # ---- batch tiling: big, evenly-split tiles; megacore split only on v7x --
    n_steps = max(1, -(-B // batch_tile))            # cdiv
    if _tensorcores_per_chip() >= 2:
        if n_steps == 1 and B >= 2 * _SUBLANE:
            n_steps = 2                              # give the 2nd TC work
        elif n_steps > 1 and n_steps % 2:
            n_steps += 1                             # balanced megacore split
    tb = _round_up(-(-B // n_steps), _SUBLANE)
    B_pad = _round_up(B, tb)
    grid = (B_pad // tb,)

    if B_pad != B:
        x = jnp.pad(x, ((0, B_pad - B), (0, 0)))

    def whole(shape):
        return pl.BlockSpec(shape, lambda i: (0, 0))

    itemsize = jnp.dtype(cdt).itemsize
    flops = 2 * B_pad * (K * H_pad + H_pad * H_pad + H_pad * P)
    bytes_accessed = (B_pad * K * itemsize
                      + B_pad * P * jnp.dtype(out_dtype).itemsize
                      + (w1.size + w2.size + wh.size) * itemsize
                      + (b1.size + b2.size + bh.size) * 4)

    out = pl.pallas_call(
        _decoder_kernel,
        out_shape=jax.ShapeDtypeStruct((B_pad, P), out_dtype),
        grid_spec=pltpu.PrefetchScalarGridSpec(
            num_scalar_prefetch=0,
            grid=grid,
            in_specs=[
                pl.BlockSpec((tb, K), lambda i: (i, 0)),      # fused input
                whole((K, H_pad)), whole((1, H_pad)),          # layer 1
                whole((H_pad, H_pad)), whole((1, H_pad)),      # layer 2
                whole((H_pad, P)), whole((1, P)),              # fused head
            ],
            out_specs=pl.BlockSpec((tb, P), lambda i: (i, 0)),
        ),
        compiler_params=pltpu.CompilerParams(
            dimension_semantics=("parallel",)),
        cost_estimate=pl.CostEstimate(flops=flops, transcendentals=0,
                                      bytes_accessed=bytes_accessed),
    )(x, w1, b1, w2, b2, wh, bh)
    return out


def trajectory_decoder_forward(current_states, current_actions, task_embeddings,
                               prepared, state_dim, *, batch_tile=1024):
    """API-compatible wrapper: (predicted_states [B,S], predicted_rewards [B,1]).

    Prefer `trajectory_decoder_forward_fused` + lazy consumer-side slicing when
    output-HBM traffic matters.
    """
    out = trajectory_decoder_forward_fused(
        current_states, current_actions, task_embeddings, prepared,
        batch_tile=batch_tile)
    B = current_states.shape[0]
    return out[:B, :state_dim], out[:B, state_dim:state_dim + 1]


# --------------------------------------------------------------------------- #
# Parameter init (matches the PyTorch module) + pure-JAX reference
# --------------------------------------------------------------------------- #
def _xavier_uniform(key, fan_in, fan_out, dtype=jnp.float32):
    """Matches nn.init.xavier_uniform_ (gain=1); stored [in, out] so fwd is x @ W."""
    limit = (6.0 / (fan_in + fan_out)) ** 0.5
    return jax.random.uniform(key, (fan_in, fan_out), dtype, -limit, limit)


def init_params(key, state_dim, action_dim, latent_dim, hidden_dim):
    input_dim = state_dim + action_dim + latent_dim
    k1, k2, k3, k4 = jax.random.split(key, 4)
    return {
        "w1": _xavier_uniform(k1, input_dim, hidden_dim),
        "b1": jnp.zeros((1, hidden_dim), jnp.float32),
        "w2": _xavier_uniform(k2, hidden_dim, hidden_dim),
        "b2": jnp.zeros((1, hidden_dim), jnp.float32),
        "ws": _xavier_uniform(k3, hidden_dim, state_dim),
        "bs": jnp.zeros((1, state_dim), jnp.float32),
        "wr": _xavier_uniform(k4, hidden_dim, 1),
        "br": jnp.zeros((1, 1), jnp.float32),
    }


def _reference_forward(current_states, current_actions, task_embeddings, params):
    """Pure-JAX f32 reference of the PyTorch module (eval mode)."""
    x = jnp.concatenate([current_states, current_actions, task_embeddings], axis=-1)
    h = jnp.maximum(x @ params["w1"] + params["b1"], 0.0)
    h = jnp.maximum(h @ params["w2"] + params["b2"], 0.0)
    return h @ params["ws"] + params["bs"], h @ params["wr"] + params["br"]


if __name__ == "__main__":
    state_dim, action_dim, latent_dim, hidden_dim = 16, 4, 5, 128
    batch = 8

    key = jax.random.PRNGKey(0)
    kp, ks, ka, km = jax.random.split(key, 4)

    params = init_params(kp, state_dim, action_dim, latent_dim, hidden_dim)
    prepared = prepare_decoder_params(params)          # hoisted: once per param load

    current_states = jax.random.normal(ks, (batch, state_dim), jnp.float32)
    current_actions = jax.random.normal(ka, (batch, action_dim), jnp.float32)
    task_embeddings = jax.random.normal(km, (batch, latent_dim), jnp.float32)

    pred_states, pred_rewards = trajectory_decoder_forward(
        current_states, current_actions, task_embeddings, prepared, state_dim)
    jax.block_until_ready((pred_states, pred_rewards))

    ref_states, ref_rewards = _reference_forward(
        current_states, current_actions, task_embeddings, params)

    assert pred_states.shape == (batch, state_dim)
    assert pred_rewards.shape == (batch, 1)
    # bf16 matmuls with f32 accumulation -> relaxed tolerance vs the f32 reference.
    assert jnp.allclose(pred_states, ref_states, atol=3e-2, rtol=3e-2)
    assert jnp.allclose(pred_rewards, ref_rewards, atol=3e-2, rtol=3e-2)

    print("KERNEL_OK")
</pallas_src>

<mosaic_0001>
module attributes {stable_mosaic.version = 11 : i64} {
  func.func @_decoder_kernel(%arg0: i32, %arg1: memref<8x25xbf16, #tpu.memory_space<vmem>>, %arg2: memref<25x128xbf16, #tpu.memory_space<vmem>>, %arg3: memref<1x128xf32, #tpu.memory_space<vmem>>, %arg4: memref<128x128xbf16, #tpu.memory_space<vmem>>, %arg5: memref<1x128xf32, #tpu.memory_space<vmem>>, %arg6: memref<128x128xbf16, #tpu.memory_space<vmem>>, %arg7: memref<1x128xf32, #tpu.memory_space<vmem>>, %arg8: memref<8x128xf32, #tpu.memory_space<vmem>>) attributes {dimension_semantics = [#tpu.dimension_semantics<parallel>], iteration_bounds = array<i64: 1>, scalar_prefetch = 0 : i64, scratch_operands = 0 : i64, tpu.core_type = #tpu.core_type<tc>, window_params = [{transform_indices = @transform_0, window_bounds = array<i64: 8, 25>}, {pipeline_mode = #tpu.pipeline_mode<synchronous>, transform_indices = @transform_1, window_bounds = array<i64: 25, 128>}, {pipeline_mode = #tpu.pipeline_mode<synchronous>, transform_indices = @transform_2, window_bounds = array<i64: 1, 128>}, {pipeline_mode = #tpu.pipeline_mode<synchronous>, transform_indices = @transform_3, window_bounds = array<i64: 128, 128>}, {pipeline_mode = #tpu.pipeline_mode<synchronous>, transform_indices = @transform_4, window_bounds = array<i64: 1, 128>}, {pipeline_mode = #tpu.pipeline_mode<synchronous>, transform_indices = @transform_5, window_bounds = array<i64: 128, 128>}, {pipeline_mode = #tpu.pipeline_mode<synchronous>, transform_indices = @transform_6, window_bounds = array<i64: 1, 128>}, {transform_indices = @transform_7, window_bounds = array<i64: 8, 128>}]} {
    %c0 = arith.constant 0 : index
    %c0_0 = arith.constant 0 : index
    %0 = vector.load %arg1[%c0, %c0_0] : memref<8x25xbf16, #tpu.memory_space<vmem>>, vector<8x25xbf16>
    %c0_1 = arith.constant 0 : index
    %c0_2 = arith.constant 0 : index
    %1 = vector.load %arg2[%c0_1, %c0_2] : memref<25x128xbf16, #tpu.memory_space<vmem>>, vector<25x128xbf16>
    %cst = arith.constant dense<0.000000e+00> : vector<8x128xf32>
    %2 = tpu.matmul %0, %1, %cst {dimension_numbers = #tpu.dot_dimension_numbers<[1], [0], [0], [1], [0, 0, 1, 1], [], []>} : vector<8x25xbf16>, vector<25x128xbf16>, vector<8x128xf32> -> vector<8x128xf32>
    %c0_3 = arith.constant 0 : index
    %c0_4 = arith.constant 0 : index
    %3 = vector.load %arg3[%c0_3, %c0_4] : memref<1x128xf32, #tpu.memory_space<vmem>>, vector<1x128xf32>
    %4 = vector.broadcast %3 : vector<1x128xf32> to vector<8x128xf32>
    %5 = arith.addf %2, %4 : vector<8x128xf32>
    %cst_5 = arith.constant 0.000000e+00 : f32
    %6 = vector.broadcast %cst_5 : f32 to vector<8x128xf32>
    %7 = arith.maximumf %5, %6 : vector<8x128xf32>
    %8 = arith.truncf %7 : vector<8x128xf32> to vector<8x128xbf16>
    %c0_6 = arith.constant 0 : index
    %c0_7 = arith.constant 0 : index
    %9 = vector.load %arg4[%c0_6, %c0_7] : memref<128x128xbf16, #tpu.memory_space<vmem>>, vector<128x128xbf16>
    %cst_8 = arith.constant dense<0.000000e+00> : vector<8x128xf32>
    %10 = tpu.matmul %8, %9, %cst_8 {dimension_numbers = #tpu.dot_dimension_numbers<[1], [0], [0], [1], [0, 0, 1, 1], [], []>} : vector<8x128xbf16>, vector<128x128xbf16>, vector<8x128xf32> -> vector<8x128xf32>
    %c0_9 = arith.constant 0 : index
    %c0_10 = arith.constant 0 : index
    %11 = vector.load %arg5[%c0_9, %c0_10] : memref<1x128xf32, #tpu.memory_space<vmem>>, vector<1x128xf32>
    %12 = vector.broadcast %11 : vector<1x128xf32> to vector<8x128xf32>
    %13 = arith.addf %10, %12 : vector<8x128xf32>
    %cst_11 = arith.constant 0.000000e+00 : f32
    %14 = vector.broadcast %cst_11 : f32 to vector<8x128xf32>
    %15 = arith.maximumf %13, %14 : vector<8x128xf32>
    %16 = arith.truncf %15 : vector<8x128xf32> to vector<8x128xbf16>
    %c0_12 = arith.constant 0 : index
    %c0_13 = arith.constant 0 : index
    %17 = vector.load %arg6[%c0_12, %c0_13] : memref<128x128xbf16, #tpu.memory_space<vmem>>, vector<128x128xbf16>
    %cst_14 = arith.constant dense<0.000000e+00> : vector<8x128xf32>
    %18 = tpu.matmul %16, %17, %cst_14 {dimension_numbers = #tpu.dot_dimension_numbers<[1], [0], [0], [1], [0, 0, 1, 1], [], []>} : vector<8x128xbf16>, vector<128x128xbf16>, vector<8x128xf32> -> vector<8x128xf32>
    %c0_15 = arith.constant 0 : index
    %c0_16 = arith.constant 0 : index
    %19 = vector.load %arg7[%c0_15, %c0_16] : memref<1x128xf32, #tpu.memory_space<vmem>>, vector<1x128xf32>
    %20 = vector.broadcast %19 : vector<1x128xf32> to vector<8x128xf32>
    %21 = arith.addf %18, %20 : vector<8x128xf32>
    %c0_17 = arith.constant 0 : index
    %c0_18 = arith.constant 0 : index
    %22 = vector.load %arg8[%c0_17, %c0_18] : memref<8x128xf32, #tpu.memory_space<vmem>>, vector<8x128xf32>
    tpu.vector_store %arg8[%c0_17, %c0_18], %21 {strides = array<i32>} : memref<8x128xf32, #tpu.memory_space<vmem>>, vector<8x128xf32>,
    return
  }
  func.func @transform_0(%arg0: i32) -> (i32, i32) {
    %c0_i32 = arith.constant 0 : i32
    %c0_i32_0 = arith.constant 0 : i32
    return %arg0, %c0_i32 : i32, i32
  }
  func.func @transform_1(%arg0: i32) -> (i32, i32) {
    %c0_i32 = arith.constant 0 : i32
    %c0_i32_0 = arith.constant 0 : i32
    %c0_i32_1 = arith.constant 0 : i32
    return %c0_i32, %c0_i32_0 : i32, i32
  }
  func.func @transform_2(%arg0: i32) -> (i32, i32) {
    %c0_i32 = arith.constant 0 : i32
    %c0_i32_0 = arith.constant 0 : i32
    %c0_i32_1 = arith.constant 0 : i32
    return %c0_i32, %c0_i32_0 : i32, i32
  }
  func.func @transform_3(%arg0: i32) -> (i32, i32) {
    %c0_i32 = arith.constant 0 : i32
    %c0_i32_0 = arith.constant 0 : i32
    %c0_i32_1 = arith.constant 0 : i32
    return %c0_i32, %c0_i32_0 : i32, i32
  }
  func.func @transform_4(%arg0: i32) -> (i32, i32) {
    %c0_i32 = arith.constant 0 : i32
    %c0_i32_0 = arith.constant 0 : i32
    %c0_i32_1 = arith.constant 0 : i32
    return %c0_i32, %c0_i32_0 : i32, i32
  }
  func.func @transform_5(%arg0: i32) -> (i32, i32) {
    %c0_i32 = arith.constant 0 : i32
    %c0_i32_0 = arith.constant 0 : i32
    %c0_i32_1 = arith.constant 0 : i32
    return %c0_i32, %c0_i32_0 : i32, i32
  }
  func.func @transform_6(%arg0: i32) -> (i32, i32) {
    %c0_i32 = arith.constant 0 : i32
    %c0_i32_0 = arith.constant 0 : i32
    %c0_i32_1 = arith.constant 0 : i32
    return %c0_i32, %c0_i32_0 : i32, i32
  }
  func.func @transform_7(%arg0: i32) -> (i32, i32) {
    %c0_i32 = arith.constant 0 : i32
    %c0_i32_0 = arith.constant 0 : i32
    return %arg0, %c0_i32 : i32, i32
  }
}

</mosaic_0001>

<bundles_post_ra>
// kernel: trajectory_decoder_forward_fused.1
= control target key start
LH: loop header
LB: loop body
LE: loop exit
PB: predicated region body
PF: predicated region fallthrough
CT: control target
= control target key end

     0   :  { %12 = vsyncpa [#allocation3], 0  ;;  %s543_s0 = inlined_call_operand.vmem [shape: bf16[8,25], index: 0, kind: input, shape index: {}]   ;;  %s544_s1 = inlined_call_operand.vmem [shape: bf16[25,128], index: 1, kind: input, shape index: {}]   ;;  %s545_s2 = inlined_call_operand.vmem [shape: f32[1,128], index: 2, kind: input, shape index: {}]   ;;  %s546_s3 = inlined_call_operand.hbm [shape: bf16[128,128], index: 3, kind: input, shape index: {}]   ;;  %s547_s4 = inlined_call_operand.vmem [shape: f32[1,128], index: 4, kind: input, shape index: {}]   ;;  %s548_s5 = inlined_call_operand.hbm [shape: bf16[128,128], index: 5, kind: input, shape index: {}]   ;;  %s549_s6 = inlined_call_operand.vmem [shape: f32[1,128], index: 6, kind: input, shape index: {}]   ;;  %s550_s7 = inlined_call_operand.hbm [shape: f32[8,128], index: 7, kind: output, shape index: {}]  }
   0x1   :  { %13 = vsyncpa [#allocation6], 0 }
   0x2   :  { %14 = vsyncpa [#allocation4], 0  ;;  %s25_s26 = sshll.u32 %s546_s3, 4  ;;  %s467_s27 = smov [#allocation2]   ;;  %s26_s26 = int_to_ptr.hbm [resolvable:$true] %s25_s26 }
   0x3   :  { %s27_s28 = sshll.u32 %s467_s27, 4  ;;  %s40_s8 = sshll.u32 %s548_s5, 4  ;;  %s28_s28 = int_to_ptr.vmem [resolvable:$true] %s27_s28  ;;  %s41_s8 = int_to_ptr.hbm [resolvable:$true] %s40_s8 }
   0x4   :  { %s468_s9 = smov 64   ;;  %s469_s10 = smov 4  }
   0x5   :  { %33 = dma.hbm_to_vmem [thread:$0]  %s26_s26, 1024, %s28_s28, [#allocation3], %s468_s9, %s468_s9, %s469_s10  }
   0x6   :  { %s470_s11 = smov [#allocation5]  }
   0x7   :  { %s42_s12 = sshll.u32 %s470_s11, 4  ;;  %s43_s12 = int_to_ptr.vmem [resolvable:$true] %s42_s12 }
   0x8   :  { %48 = dma.hbm_to_vmem [thread:$0]  %s41_s8, 1024, %s43_s12, [#allocation6], %s468_s9, %s468_s9, %s469_s10  }
   0x9   :  { %461 = dma.done.wait [#allocation3], 1024  }
   0xa   :  { %462 = vsyncadd [#allocation3], 4294966272 }
   0xb   :  { %463 = dma.done.wait [#allocation6], 1024  }
   0xc   :  { %464 = vsyncadd [#allocation6], 4294966272  ;;  %vm84_vm0 = vcmask 1043456   ;;  %vm85_vm1 = vcmask 1044480   ;;  %v471_v0 = vmov 65535   ;;  %v371_v6 = vld [vmem:[#allocation2 + $0x38] sm:$0xff] }
   0xd   :  { %v86_v1 = vsel %vm84_vm0, 4294967295, %v471_v0  ;;  %v295_v2 = vld [vmem:[%s544_s1 + $0x8] sm:$0xf]  ;;  %v363_v3 = vld [vmem:[%s544_s1 + $0x8] sm:$0x10]  ;;  %174 = vmatpush.bf16.msra.mxu1 %v371_v6  ;;  %v370_v8 = vld [vmem:[#allocation2 + $0x30] sm:$0xff] }
   0xe   :  { %v87_v4 = vsel %vm85_vm1, %v86_v1, 0  ;;  %v296_v5 = vor.u32 %v363_v3, %v295_v2  ;;  %v362_v9 = vld [vmem:[%s544_s1] sm:$0xff]  ;;  %v369_v10 = vld [vmem:[#allocation2 + $0x28] sm:$0xff]  ;;  %vm80_vm2 = vcmask 203776   ;;  %v367_v13 = vld [vmem:[#allocation2 + $0x18] sm:$0xff]  ;;  %s472_s22 = smov [#allocation7]  }
   0xf   :  { %v60_v11 = vld [vmem:[%s543_s0] sm:$0xf]  ;;  %v366_v14 = vld [vmem:[#allocation2 + $0x10] sm:$0xff]  ;;  %v365_v15 = vld [vmem:[#allocation2 + $0x8] sm:$0xff]  ;;  %s276_s23 = sshll.u32 %s472_s22, 4  ;;  %s278_s26 = sshll.u32 %s550_s7, 4  ;;  %s277_s23 = int_to_ptr.vmem [resolvable:$true] %s276_s23  ;;  %s279_s26 = int_to_ptr.hbm [resolvable:$true] %s278_s26 }
  0x10   :  { %v89_v7 = vand.u32 %v296_v5, %v87_v4  ;;  %v368_v12 = vld [vmem:[#allocation2 + $0x20] sm:$0xff]  ;;  %v379_v17 = vld [vmem:[#allocation5 + $0x38] sm:$0xff]  ;;  %v378_v18 = vld [vmem:[#allocation5 + $0x30] sm:$0xff] }
  0x11   :  { %175 = vmatpush.bf16.msra.mxu1 %v370_v8  ;;  %v364_v16 = vld [vmem:[#allocation2] sm:$0xff]  ;;  %257 = vmatpush.bf16.msra.mxu2 %v379_v17  ;;  %v377_v19 = vld [vmem:[#allocation5 + $0x28] sm:$0xff]  ;;  %v375_v21 = vld [vmem:[#allocation5 + $0x18] sm:$0xff] }
  0x12   :  { %97 = vmatpush.bf16.msra.mxu0 %v89_v7  ;;  %v376_v20 = vld [vmem:[#allocation5 + $0x20] sm:$0xff]  ;;  %v374_v22 = vld [vmem:[#allocation5 + $0x10] sm:$0xff]  ;;  %v373_v29 = vld [vmem:[#allocation5 + $0x8] sm:$0xff] }
  0x13   :  { %v386_v23 = vld [vmem:[%s545_s2] ss:$0 sm:$0xff] }
  0x14   :  { %v372_v30 = vld [vmem:[#allocation5] sm:$0xff] }
  0x15   :  { %176 = vmatpush.bf16.msra.mxu1 %v369_v10  ;;  %258 = vmatpush.bf16.msra.mxu2 %v378_v18  ;;  %v387_v31 = vld [vmem:[%s547_s4] ss:$0 sm:$0xff] }
  0x16   :  { %98 = vmatpush.bf16.msra.mxu0 %v362_v9  ;;  %v388_v37 = vld [vmem:[%s549_s6] ss:$0 sm:$0xff] }
  0x19   :  { %297 = vmatmul.msk.bf16.vlgmr.msra.gmra.mxu0 %vm80_vm2, %v60_v11  ;;  %177 = vmatpush.bf16.msra.mxu1 %v368_v12 }
  0x1a   :  { %259 = vmatpush.bf16.msra.mxu2 %v377_v19 }
  0x1d   :  { %178 = vmatpush.bf16.msra.mxu1 %v367_v13 }
  0x1e   :  { %260 = vmatpush.bf16.msra.mxu2 %v376_v20 }
  0x21   :  { %179 = vmatpush.bf16.msra.mxu1 %v366_v14 }
  0x22   :  { %261 = vmatpush.bf16.msra.mxu2 %v375_v21 }
  0x25   :  { %180 = vmatpush.bf16.msra.mxu1 %v365_v15 }
  0x26   :  { %262 = vmatpush.bf16.msra.mxu2 %v374_v22 }
  0x29   :  { %181 = vmatpush.bf16.msra.mxu1 %v364_v16 }
  0x2a   :  { %263 = vmatpush.bf16.msra.mxu2 %v373_v29 }
  0x2e   :  { %264 = vmatpush.bf16.msra.mxu2 %v372_v30 }
  0x96   :  { %v100_v24 = vpop.f32.mrf.mxu0 }
  0x97   :  { %v101_v25 = vadd.f32 %v386_v23, %v100_v24 }
  0x99   :  { %v104_v26 = vmax.f32 %v101_v25, 0.0 }
  0x9b   :  { %v105_v27 = vpack.c.bf16 %v104_v26, %v104_v26 }
  0x9d   :  { %182 = vmatmul.bf16.vlgmr.msra.gmra.mxu1 %v105_v27 }
  0x9e   :  { %v102_v28 = vpop.f32.mrf.mxu0 }
 0x11a   :  { %v183_v32 = vpop.f32.mrf.mxu1 }
 0x11b   :  { %v184_v33 = vadd.f32 %v387_v31, %v183_v32 }
 0x11d   :  { %v187_v34 = vmax.f32 %v184_v33, 0.0 }
 0x11f   :  { %v188_v35 = vpack.c.bf16 %v187_v34, %v187_v34 }
 0x121   :  { %265 = vmatmul.bf16.vlgmr.msra.gmra.mxu2 %v188_v35 }
 0x122   :  { %v185_v36 = vpop.f32.mrf.mxu1 }
 0x1a4   :  { %v266_v38 = vpop.f32.mrf.mxu2 }
 0x1a5   :  { %v267_v39 = vadd.f32 %v388_v37, %v266_v38 }
 0x1a7   :  { %270 = vst [vmem:[#allocation7] sm:$0xff] %v267_v39 }
 0x1a8   :  { %281 = dma.vmem_to_hbm [thread:$0]  %s277_s23, 128, %s279_s26, [#allocation4]  }
 0x1ac   :  { %v268_v40 = vpop.f32.mrf.mxu2 }
 0x1ad   :  { %465 = dma.done.wait [#allocation4], 128  }
 0x1ae   :  { %466 = vsyncadd [#allocation4], 4294967168 }
 0x1af   :  { %286 = vsyncpa [#allocation3], 1 }
 0x1b0   :  { %287 = vsyncpa [#allocation6], 1 }
 0x1b1   :  { %288 = vsyncpa [#allocation4], 1 }

</bundles_post_ra>
